<compile_context>
chip_gen: v7x
topology: tpu7x:2x2x1
jax: 0.10.0
libtpu: 0.0.40
codegen_flags: <defaults>
</compile_context>

<pallas_src>
import functools

import jax
import jax.numpy as jnp
from jax.experimental import pallas as pl
from jax.experimental.pallas import tpu as pltpu

C_PAD = 128  # lane-padded feature width (covers C_IN=8, HIDDEN=32, OUT=1)


def fused_gcn_kernel(a_ref, x_ref, w_ref, b_ref, lw_ref, lb_ref,
                     o_ref, acc_ref, h_ref):
    """One grid step: acc (+)= A[i,k] @ H_prev[k]; on the last k tile apply the
    layer weight/bias/ReLU, store bf16 activations into the ping-pong slot and,
    on the last layer, the fused output Linear."""
    l = pl.program_id(0)                 # layer index (sequential)
    i = pl.program_id(1)                 # output row tile
    k = pl.program_id(2)                 # reduction (column) tile
    n_layers = pl.num_programs(0)
    n_k = pl.num_programs(2)
    tm = acc_ref.shape[0]
    tk = a_ref.shape[1]

    # Seed the activation buffer with the (bf16, zero-padded) node features
    # exactly once, at the very first grid step.  The grid runs sequentially
    # on one TensorCore, so every later read of slot 0 during layer 0 sees
    # this data -- stale VMEM never reaches the accumulator.
    @pl.when((l == 0) & (i == 0) & (k == 0))
    def _():
        h_ref[0] = x_ref[...]

    # Previous-layer activations for this K tile: one dynamically indexed bf16
    # load.  Layer l reads slot l % 2 and writes slot (l + 1) % 2.
    row = pl.multiple_of(k * tk, tk)
    h_prev = h_ref[l % 2, pl.ds(row, tk), :]           # (tk, C_PAD) bf16

    # Aggregation on the MXU: bf16 x bf16 -> f32 accumulation.
    contrib = jnp.dot(a_ref[...], h_prev, preferred_element_type=jnp.float32)

    @pl.when(k == 0)
    def _():
        acc_ref[...] = contrib            # first K tile: direct write, no zero-init

    @pl.when(k > 0)
    def _():
        acc_ref[...] += contrib

    @pl.when(k == n_k - 1)
    def _():
        out_row = pl.multiple_of(i * tm, tm)
        # H_{l+1} = relu((A_hat @ H_l) @ W_l + b_l)  (== A_hat @ (H_l W_l) + b_l).
        # bf16 MXU inputs, f32 accumulation; bias add / ReLU on the VPU in f32.
        h_new = jnp.maximum(
            jnp.dot(acc_ref[...].astype(jnp.bfloat16), w_ref[l],
                    preferred_element_type=jnp.float32) + b_ref[l],
            0.0)
        h_new_bf = h_new.astype(jnp.bfloat16)
        h_ref[(l + 1) % 2, pl.ds(out_row, tm), :] = h_new_bf

        # Fused final Linear on the last layer; output stays 128-lane dense,
        # the wrapper slices column 0 / the first N rows.
        @pl.when(l == n_layers - 1)
        def _():
            o_ref[pl.ds(out_row, tm), :] = (
                jnp.dot(h_new_bf, lw_ref[...],
                        preferred_element_type=jnp.float32) + lb_ref[...])


def _round_up(x, m):
    return (x + m - 1) // m * m


def _vmem_limit_bytes(n_pad, tm, tk, c_pad, n_layers):
    bf16, f32 = 2, 4
    ws = (
        2 * tm * tk * bf16                                   # A tiles (double-buffered)
        + 2 * n_pad * c_pad * bf16                           # resident X (spec 2-buffered)
        + 2 * n_layers * (c_pad * c_pad * bf16 + 8 * c_pad * f32)   # W_l / b_l resident
        + 2 * (c_pad * c_pad * bf16 + 8 * c_pad * f32)       # lin_w / lin_b resident
        + 2 * n_pad * c_pad * f32                            # resident output
        + tm * c_pad * f32                                   # f32 accumulator scratch
        + 2 * n_pad * c_pad * bf16                           # bf16 ping-pong activations
    )
    # Headroom for compiler scratch; never claim all of v7x's 64 MiB physical VMEM.
    return int(min(max(ws + (8 << 20), 16 << 20), 48 << 20))


def fused_gcn(a_pad, x_pad, w_all, b_all, lin_w, lin_b, *, tm, tk):
    n_pad, c_pad = x_pad.shape
    n_layers = w_all.shape[0]
    grid = (n_layers, n_pad // tm, n_pad // tk)
    return pl.pallas_call(
        fused_gcn_kernel,
        out_shape=jax.ShapeDtypeStruct((n_pad, c_pad), jnp.float32),
        grid_spec=pltpu.PrefetchScalarGridSpec(
            num_scalar_prefetch=0,
            grid=grid,
            in_specs=[
                # A_hat streamed as bf16 (tm, tk) tiles.  With the collapsed
                # grid (tm = tk = n_pad) the block index is constant, so A is
                # DMA'd once and stays resident for all 7 layers.
                pl.BlockSpec((tm, tk), lambda l, i, k: (i, k)),
                # Padded bf16 node features: whole-array resident (one DMA).
                pl.BlockSpec((n_pad, c_pad), lambda l, i, k: (0, 0)),
                # All layer weights / biases resident (one DMA each); the
                # kernel indexes the layer with pl.program_id(0).
                pl.BlockSpec((n_layers, c_pad, c_pad), lambda l, i, k: (0, 0, 0)),
                pl.BlockSpec((n_layers, 1, c_pad), lambda l, i, k: (0, 0, 0)),
                # Final Linear weight / bias: resident.
                pl.BlockSpec((c_pad, c_pad), lambda l, i, k: (0, 0)),
                pl.BlockSpec((1, c_pad), lambda l, i, k: (0, 0)),
            ],
            # Constant output block index -> output stays resident in VMEM for
            # the whole grid and is written back to HBM exactly once.
            out_specs=pl.BlockSpec((n_pad, c_pad), lambda l, i, k: (0, 0)),
            scratch_shapes=[
                pltpu.VMEM((tm, c_pad), jnp.float32),        # f32 accumulator
                pltpu.VMEM((2, n_pad, c_pad), jnp.bfloat16),  # ping-pong activations
            ],
        ),
        compiler_params=pltpu.CompilerParams(
            # Layer and row axes carry dependencies through the VMEM activation
            # scratch, so the fused form is sequential on one TensorCore.
            dimension_semantics=("arbitrary", "arbitrary", "arbitrary"),
            vmem_limit_bytes=_vmem_limit_bytes(n_pad, tm, tk, c_pad, n_layers),
        ),
    )(a_pad, x_pad, w_all, b_all, lin_w, lin_b)


def build_norm_adj(edge_index, num_nodes):
    """Dense GCN-normalized adjacency: D^{-1/2} (A + I) D^{-1/2} (f32)."""
    src, dst = edge_index[0], edge_index[1]
    a = jnp.zeros((num_nodes, num_nodes), jnp.float32)
    a = a.at[dst, src].set(1.0)
    a = a + jnp.eye(num_nodes, dtype=jnp.float32)     # add self loops
    deg = a.sum(axis=1)
    d_inv_sqrt = jnp.where(deg > 0, jax.lax.rsqrt(deg), 0.0)
    return d_inv_sqrt[:, None] * a * d_inv_sqrt[None, :]


def init_params(key, node_in, hidden, out_channels=1, num_layers=7):
    """Deterministic synthetic parameters (glorot-uniform-ish)."""
    params = {"convs": []}
    dims = [node_in] + [hidden] * num_layers
    for i in range(num_layers):
        key, k1 = jax.random.split(key)
        fan_in, fan_out = dims[i], dims[i + 1]
        scale = float(jnp.sqrt(6.0 / (fan_in + fan_out)))
        w = jax.random.uniform(k1, (fan_in, fan_out), jnp.float32, -scale, scale)
        b = jnp.zeros((fan_out,), jnp.float32)
        params["convs"].append((w, b))
    key, k2, k3 = jax.random.split(key, 3)
    scale = float(1.0 / jnp.sqrt(hidden))
    params["lin_w"] = jax.random.uniform(
        k2, (hidden, out_channels), jnp.float32, -scale, scale)
    params["lin_b"] = jax.random.uniform(
        k3, (out_channels,), jnp.float32, -scale, scale)
    return params


def pack_params(params, c_pad):
    """Zero-pad layers to (c_pad, c_pad), stack, cast matmul operands to bf16."""
    n_layers = len(params["convs"])
    w_all = jnp.zeros((n_layers, c_pad, c_pad), jnp.float32)
    b_all = jnp.zeros((n_layers, 1, c_pad), jnp.float32)
    for l, (w, b) in enumerate(params["convs"]):
        w_all = w_all.at[l, :w.shape[0], :w.shape[1]].set(w)
        b_all = b_all.at[l, 0, :b.shape[0]].set(b)
    lw = params["lin_w"]
    lin_w = jnp.zeros((c_pad, c_pad), jnp.float32).at[:lw.shape[0], :lw.shape[1]].set(lw)
    lin_b = jnp.zeros((1, c_pad), jnp.float32).at[0, :params["lin_b"].shape[0]].set(
        params["lin_b"])
    return (w_all.astype(jnp.bfloat16), b_all,
            lin_w.astype(jnp.bfloat16), lin_b)


def baseline_gcn_forward(params, x, edge_index, num_nodes):
    n = num_nodes
    c_in = x.shape[1]
    n_pad = _round_up(max(n, 256), 256)
    # Collapse the row/k grid entirely when the whole graph fits (grid=(7,1,1),
    # A resident); otherwise 256-wide tiles to match the v6e/v7x 256-deep MXU.
    tm = tk = n_pad if n_pad <= 1024 else 256

    # NOTE: padded rows of H become relu(b) after each layer; they are
    # neutralized only because the padded rows/columns of A are zero.  Keep
    # the two padding schemes coupled.
    a_hat = build_norm_adj(edge_index, n)
    a_pad = jnp.zeros((n_pad, n_pad), jnp.bfloat16).at[:n, :n].set(
        a_hat.astype(jnp.bfloat16))
    x_pad = jnp.zeros((n_pad, C_PAD), jnp.bfloat16).at[:n, :c_in].set(
        x.astype(jnp.bfloat16))
    w_all, b_all, lin_w, lin_b = pack_params(params, C_PAD)

    out_pad = fused_gcn(a_pad, x_pad, w_all, b_all, lin_w, lin_b, tm=tm, tk=tk)
    out_channels = params["lin_w"].shape[1]
    return out_pad[:n, :out_channels].squeeze()     # matches x.squeeze()


def reference_forward(params, x, edge_index, num_nodes):
    """Pure f32 JAX reference matching the PyTorch module semantics."""
    a = build_norm_adj(edge_index, num_nodes)
    h = x.astype(jnp.float32)
    for (w, b) in params["convs"]:
        h = jnp.maximum(a @ (h @ w) + b, 0.0)
    return (h @ params["lin_w"] + params["lin_b"]).squeeze()


if __name__ == "__main__":
    key = jax.random.PRNGKey(0)
    N, C_IN, HIDDEN, C_OUT = 200, 8, 32, 1
    k_feat, k_edge, k_edge2, k_param = jax.random.split(key, 4)

    # Node features
    x = jax.random.normal(k_feat, (N, C_IN), jnp.float32)

    # Random undirected graph (no self loops in the edge list; GCN adds them)
    n_e = 400
    src = jax.random.randint(k_edge, (n_e,), 0, N)
    dst = (src + jax.random.randint(k_edge2, (n_e,), 1, N)) % N
    edge_index = jnp.stack([jnp.concatenate([src, dst]),
                            jnp.concatenate([dst, src])]).astype(jnp.int32)

    params = init_params(k_param, C_IN, HIDDEN, C_OUT)

    fwd = jax.jit(functools.partial(baseline_gcn_forward, num_nodes=N))
    out = fwd(params, x, edge_index)
    jax.block_until_ready(out)

    assert out.shape == (N,), out.shape
    assert bool(jnp.all(jnp.isfinite(out)))

    # Numerics check vs a pure-f32 reference (bf16 A/activations over 7 layers).
    ref = reference_forward(params, x, edge_index, N)
    max_err = float(jnp.max(jnp.abs(out - ref)))
    assert max_err < 5e-2, f"max abs error vs f32 reference: {max_err}"

    print("KERNEL_OK")
</pallas_src>

<mosaic_0001>
module attributes {stable_mosaic.version = 11 : i64} {
  func.func @fused_gcn_kernel(%arg0: i32, %arg1: i32, %arg2: i32, %arg3: memref<256x256xbf16, #tpu.memory_space<vmem>>, %arg4: memref<256x128xbf16, #tpu.memory_space<vmem>>, %arg5: memref<7x128x128xbf16, #tpu.memory_space<vmem>>, %arg6: memref<7x1x128xf32, #tpu.memory_space<vmem>>, %arg7: memref<128x128xbf16, #tpu.memory_space<vmem>>, %arg8: memref<1x128xf32, #tpu.memory_space<vmem>>, %arg9: memref<256x128xf32, #tpu.memory_space<vmem>>, %arg10: memref<256x128xf32, #tpu.memory_space<vmem>>, %arg11: memref<2x256x128xbf16, #tpu.memory_space<vmem>>) attributes {dimension_semantics = [#tpu.dimension_semantics<arbitrary>, #tpu.dimension_semantics<arbitrary>, #tpu.dimension_semantics<arbitrary>], iteration_bounds = array<i64: 7, 1, 1>, scalar_prefetch = 0 : i64, scratch_operands = 2 : i64, tpu.core_type = #tpu.core_type<tc>, window_params = [{transform_indices = @transform_0, window_bounds = array<i64: 256, 256>}, {pipeline_mode = #tpu.pipeline_mode<synchronous>, transform_indices = @transform_1, window_bounds = array<i64: 256, 128>}, {pipeline_mode = #tpu.pipeline_mode<synchronous>, transform_indices = @transform_2, window_bounds = array<i64: 7, 128, 128>}, {pipeline_mode = #tpu.pipeline_mode<synchronous>, transform_indices = @transform_3, window_bounds = array<i64: 7, 1, 128>}, {pipeline_mode = #tpu.pipeline_mode<synchronous>, transform_indices = @transform_4, window_bounds = array<i64: 128, 128>}, {pipeline_mode = #tpu.pipeline_mode<synchronous>, transform_indices = @transform_5, window_bounds = array<i64: 1, 128>}, {pipeline_mode = #tpu.pipeline_mode<synchronous>, transform_indices = @transform_6, window_bounds = array<i64: 256, 128>}]} {
    %c0_i32 = arith.constant 0 : i32
    %0 = arith.cmpi eq, %arg0, %c0_i32 : i32
    %c0_i32_0 = arith.constant 0 : i32
    %1 = arith.cmpi eq, %arg1, %c0_i32_0 : i32
    %2 = arith.andi %0, %1 : i1
    %c0_i32_1 = arith.constant 0 : i32
    %3 = arith.cmpi eq, %arg2, %c0_i32_1 : i32
    %4 = arith.andi %2, %3 : i1
    %5 = arith.extui %4 : i1 to i32
    %c0_i32_2 = arith.constant 0 : i32
    %6 = arith.cmpi ne, %5, %c0_i32_2 : i32
    scf.if %6 {
      %c0_15 = arith.constant 0 : index
      %c0_16 = arith.constant 0 : index
      %34 = vector.load %arg4[%c0_15, %c0_16] : memref<256x128xbf16, #tpu.memory_space<vmem>>, vector<256x128xbf16>
      %c0_17 = arith.constant 0 : index
      %c0_18 = arith.constant 0 : index
      %c0_19 = arith.constant 0 : index
      %35 = vector.load %arg11[%c0_17, %c0_18, %c0_19] : memref<2x256x128xbf16, #tpu.memory_space<vmem>>, vector<1x256x128xbf16>
      %36 = vector.shape_cast %35 : vector<1x256x128xbf16> to vector<256x128xbf16>
      %37 = vector.shape_cast %34 : vector<256x128xbf16> to vector<1x256x128xbf16>
      tpu.vector_store %arg11[%c0_17, %c0_18, %c0_19], %37 {strides = array<i32>} : memref<2x256x128xbf16, #tpu.memory_space<vmem>>, vector<1x256x128xbf16>,
    } else {
    }
    %c256_i32 = arith.constant 256 : i32
    %7 = arith.muli %arg2, %c256_i32 : i32
    %8 = tpu.assume_multiple %7, 256 : i32
    %c2_i32 = arith.constant 2 : i32
    %c0_i32_3 = arith.constant 0 : i32
    %9 = arith.cmpi eq, %c2_i32, %c0_i32_3 : i32
    %c1_i32 = arith.constant 1 : i32
    %10 = arith.select %9, %c1_i32, %c2_i32 : i32
    %11 = arith.remsi %arg0, %10 : i32
    %c0_i32_4 = arith.constant 0 : i32
    %12 = arith.cmpi ne, %11, %c0_i32_4 : i32
    %c0_i32_5 = arith.constant 0 : i32
    %13 = arith.cmpi slt, %11, %c0_i32_5 : i32
    %c0_i32_6 = arith.constant 0 : i32
    %14 = arith.cmpi slt, %10, %c0_i32_6 : i32
    %15 = arith.xori %13, %14 : i1
    %16 = arith.andi %15, %12 : i1
    %17 = arith.addi %11, %10 : i32
    %18 = arith.select %16, %17, %11 : i32
    %19 = arith.index_cast %18 : i32 to index
    %20 = arith.index_cast %8 : i32 to index
    %c0 = arith.constant 0 : index
    %21 = vector.load %arg11[%19, %20, %c0] : memref<2x256x128xbf16, #tpu.memory_space<vmem>>, vector<1x256x128xbf16>
    %22 = vector.shape_cast %21 : vector<1x256x128xbf16> to vector<256x128xbf16>
    %c0_7 = arith.constant 0 : index
    %c0_8 = arith.constant 0 : index
    %23 = vector.load %arg3[%c0_7, %c0_8] : memref<256x256xbf16, #tpu.memory_space<vmem>>, vector<256x256xbf16>
    %cst = arith.constant dense<0.000000e+00> : vector<256x128xf32>
    %24 = tpu.matmul %23, %22, %cst {dimension_numbers = #tpu.dot_dimension_numbers<[1], [0], [0], [1], [0, 0, 1, 1], [], []>} : vector<256x256xbf16>, vector<256x128xbf16>, vector<256x128xf32> -> vector<256x128xf32>
    %c0_i32_9 = arith.constant 0 : i32
    %25 = arith.cmpi eq, %arg2, %c0_i32_9 : i32
    %26 = arith.extui %25 : i1 to i32
    %c0_i32_10 = arith.constant 0 : i32
    %27 = arith.cmpi ne, %26, %c0_i32_10 : i32
    scf.if %27 {
      %c0_15 = arith.constant 0 : index
      %c0_16 = arith.constant 0 : index
      %34 = vector.load %arg10[%c0_15, %c0_16] : memref<256x128xf32, #tpu.memory_space<vmem>>, vector<256x128xf32>
      tpu.vector_store %arg10[%c0_15, %c0_16], %24 {strides = array<i32>} : memref<256x128xf32, #tpu.memory_space<vmem>>, vector<256x128xf32>,
    } else {
    }
    %c0_i32_11 = arith.constant 0 : i32
    %28 = arith.cmpi sgt, %arg2, %c0_i32_11 : i32
    %29 = arith.extui %28 : i1 to i32
    %c0_i32_12 = arith.constant 0 : i32
    %30 = arith.cmpi ne, %29, %c0_i32_12 : i32
    scf.if %30 {
      %c0_15 = arith.constant 0 : index
      %c0_16 = arith.constant 0 : index
      %34 = vector.load %arg10[%c0_15, %c0_16] : memref<256x128xf32, #tpu.memory_space<vmem>>, vector<256x128xf32>
      %35 = arith.addf %34, %24 : vector<256x128xf32>
      %c0_17 = arith.constant 0 : index
      %c0_18 = arith.constant 0 : index
      %36 = vector.load %arg10[%c0_17, %c0_18] : memref<256x128xf32, #tpu.memory_space<vmem>>, vector<256x128xf32>
      tpu.vector_store %arg10[%c0_17, %c0_18], %35 {strides = array<i32>} : memref<256x128xf32, #tpu.memory_space<vmem>>, vector<256x128xf32>,
    } else {
    }
    %c0_i32_13 = arith.constant 0 : i32
    %31 = arith.cmpi eq, %arg2, %c0_i32_13 : i32
    %32 = arith.extui %31 : i1 to i32
    %c0_i32_14 = arith.constant 0 : i32
    %33 = arith.cmpi ne, %32, %c0_i32_14 : i32
    scf.if %33 {
      %c256_i32_15 = arith.constant 256 : i32
      %34 = arith.muli %arg1, %c256_i32_15 : i32
      %35 = tpu.assume_multiple %34, 256 : i32
      %c0_16 = arith.constant 0 : index
      %c0_17 = arith.constant 0 : index
      %36 = vector.load %arg10[%c0_16, %c0_17] : memref<256x128xf32, #tpu.memory_space<vmem>>, vector<256x128xf32>
      %37 = arith.truncf %36 : vector<256x128xf32> to vector<256x128xbf16>
      %38 = arith.index_cast %arg0 : i32 to index
      %c0_18 = arith.constant 0 : index
      %c0_19 = arith.constant 0 : index
      %39 = vector.load %arg5[%38, %c0_18, %c0_19] : memref<7x128x128xbf16, #tpu.memory_space<vmem>>, vector<1x128x128xbf16>
      %40 = vector.shape_cast %39 : vector<1x128x128xbf16> to vector<128x128xbf16>
      %cst_20 = arith.constant dense<0.000000e+00> : vector<256x128xf32>
      %41 = tpu.matmul %37, %40, %cst_20 {dimension_numbers = #tpu.dot_dimension_numbers<[1], [0], [0], [1], [0, 0, 1, 1], [], []>} : vector<256x128xbf16>, vector<128x128xbf16>, vector<256x128xf32> -> vector<256x128xf32>
      %42 = arith.index_cast %arg0 : i32 to index
      %c0_21 = arith.constant 0 : index
      %c0_22 = arith.constant 0 : index
      %43 = vector.load %arg6[%42, %c0_21, %c0_22] : memref<7x1x128xf32, #tpu.memory_space<vmem>>, vector<1x1x128xf32>
      %44 = vector.shape_cast %43 : vector<1x1x128xf32> to vector<1x128xf32>
      %45 = vector.broadcast %44 : vector<1x128xf32> to vector<256x128xf32>
      %46 = arith.addf %41, %45 : vector<256x128xf32>
      %cst_23 = arith.constant 0.000000e+00 : f32
      %47 = vector.broadcast %cst_23 : f32 to vector<256x128xf32>
      %48 = arith.maximumf %46, %47 : vector<256x128xf32>
      %49 = arith.truncf %48 : vector<256x128xf32> to vector<256x128xbf16>
      %c1_i32_24 = arith.constant 1 : i32
      %50 = arith.addi %arg0, %c1_i32_24 : i32
      %c2_i32_25 = arith.constant 2 : i32
      %c0_i32_26 = arith.constant 0 : i32
      %51 = arith.cmpi eq, %c2_i32_25, %c0_i32_26 : i32
      %c1_i32_27 = arith.constant 1 : i32
      %52 = arith.select %51, %c1_i32_27, %c2_i32_25 : i32
      %53 = arith.remsi %50, %52 : i32
      %c0_i32_28 = arith.constant 0 : i32
      %54 = arith.cmpi ne, %53, %c0_i32_28 : i32
      %c0_i32_29 = arith.constant 0 : i32
      %55 = arith.cmpi slt, %53, %c0_i32_29 : i32
      %c0_i32_30 = arith.constant 0 : i32
      %56 = arith.cmpi slt, %52, %c0_i32_30 : i32
      %57 = arith.xori %55, %56 : i1
      %58 = arith.andi %57, %54 : i1
      %59 = arith.addi %53, %52 : i32
      %60 = arith.select %58, %59, %53 : i32
      %61 = arith.index_cast %60 : i32 to index
      %62 = arith.index_cast %35 : i32 to index
      %c0_31 = arith.constant 0 : index
      %63 = vector.load %arg11[%61, %62, %c0_31] : memref<2x256x128xbf16, #tpu.memory_space<vmem>>, vector<1x256x128xbf16>
      %64 = vector.shape_cast %63 : vector<1x256x128xbf16> to vector<256x128xbf16>
      %65 = vector.shape_cast %49 : vector<256x128xbf16> to vector<1x256x128xbf16>
      tpu.vector_store %arg11[%61, %62, %c0_31], %65 {strides = array<i32>} : memref<2x256x128xbf16, #tpu.memory_space<vmem>>, vector<1x256x128xbf16>,
      %c6_i32 = arith.constant 6 : i32
      %66 = arith.cmpi eq, %arg0, %c6_i32 : i32
      %67 = arith.extui %66 : i1 to i32
      %c0_i32_32 = arith.constant 0 : i32
      %68 = arith.cmpi ne, %67, %c0_i32_32 : i32
      scf.if %68 {
        %c0_33 = arith.constant 0 : index
        %c0_34 = arith.constant 0 : index
        %69 = vector.load %arg7[%c0_33, %c0_34] : memref<128x128xbf16, #tpu.memory_space<vmem>>, vector<128x128xbf16>
        %cst_35 = arith.constant dense<0.000000e+00> : vector<256x128xf32>
        %70 = tpu.matmul %49, %69, %cst_35 {dimension_numbers = #tpu.dot_dimension_numbers<[1], [0], [0], [1], [0, 0, 1, 1], [], []>} : vector<256x128xbf16>, vector<128x128xbf16>, vector<256x128xf32> -> vector<256x128xf32>
        %c0_36 = arith.constant 0 : index
        %c0_37 = arith.constant 0 : index
        %71 = vector.load %arg8[%c0_36, %c0_37] : memref<1x128xf32, #tpu.memory_space<vmem>>, vector<1x128xf32>
        %72 = vector.broadcast %71 : vector<1x128xf32> to vector<256x128xf32>
        %73 = arith.addf %70, %72 : vector<256x128xf32>
        %74 = arith.index_cast %35 : i32 to index
        %c0_38 = arith.constant 0 : index
        %75 = vector.load %arg9[%74, %c0_38] : memref<256x128xf32, #tpu.memory_space<vmem>>, vector<256x128xf32>
        tpu.vector_store %arg9[%74, %c0_38], %73 {strides = array<i32>} : memref<256x128xf32, #tpu.memory_space<vmem>>, vector<256x128xf32>,
      } else {
      }
    } else {
    }
    return
  }
  func.func @transform_0(%arg0: i32, %arg1: i32, %arg2: i32) -> (i32, i32) {
    %c0_i32 = arith.constant 0 : i32
    return %arg1, %arg2 : i32, i32
  }
  func.func @transform_1(%arg0: i32, %arg1: i32, %arg2: i32) -> (i32, i32) {
    %c0_i32 = arith.constant 0 : i32
    %c0_i32_0 = arith.constant 0 : i32
    %c0_i32_1 = arith.constant 0 : i32
    return %c0_i32, %c0_i32_0 : i32, i32
  }
  func.func @transform_2(%arg0: i32, %arg1: i32, %arg2: i32) -> (i32, i32, i32) {
    %c0_i32 = arith.constant 0 : i32
    %c0_i32_0 = arith.constant 0 : i32
    %c0_i32_1 = arith.constant 0 : i32
    %c0_i32_2 = arith.constant 0 : i32
    return %c0_i32, %c0_i32_0, %c0_i32_1 : i32, i32, i32
  }
  func.func @transform_3(%arg0: i32, %arg1: i32, %arg2: i32) -> (i32, i32, i32) {
    %c0_i32 = arith.constant 0 : i32
    %c0_i32_0 = arith.constant 0 : i32
    %c0_i32_1 = arith.constant 0 : i32
    %c0_i32_2 = arith.constant 0 : i32
    return %c0_i32, %c0_i32_0, %c0_i32_1 : i32, i32, i32
  }
  func.func @transform_4(%arg0: i32, %arg1: i32, %arg2: i32) -> (i32, i32) {
    %c0_i32 = arith.constant 0 : i32
    %c0_i32_0 = arith.constant 0 : i32
    %c0_i32_1 = arith.constant 0 : i32
    return %c0_i32, %c0_i32_0 : i32, i32
  }
  func.func @transform_5(%arg0: i32, %arg1: i32, %arg2: i32) -> (i32, i32) {
    %c0_i32 = arith.constant 0 : i32
    %c0_i32_0 = arith.constant 0 : i32
    %c0_i32_1 = arith.constant 0 : i32
    return %c0_i32, %c0_i32_0 : i32, i32
  }
  func.func @transform_6(%arg0: i32, %arg1: i32, %arg2: i32) -> (i32, i32) {
    %c0_i32 = arith.constant 0 : i32
    %c0_i32_0 = arith.constant 0 : i32
    %c0_i32_1 = arith.constant 0 : i32
    return %c0_i32, %c0_i32_0 : i32, i32
  }
}

</mosaic_0001>

<bundles_post_ra>
// kernel: baseline_gcn_forward.1
= control target key start
LH: loop header
LB: loop body
LE: loop exit
PB: predicated region body
PF: predicated region fallthrough
CT: control target
= control target key end

     0   :  { %s2199_s21 = smov 0   ;;  %s2201_s22 = smov 0   ;;  %s2711_s0 = inlined_call_operand.vmem [shape: bf16[256,256], index: 0, kind: input, shape index: {}]   ;;  %s2712_s1 = inlined_call_operand.vmem [shape: bf16[256,128], index: 1, kind: input, shape index: {}]   ;;  %s2713_s2 = inlined_call_operand.vmem [shape: bf16[7,128,128], index: 2, kind: input, shape index: {}]   ;;  %s2714_s3 = inlined_call_operand.vmem [shape: f32[7,1,128], index: 3, kind: input, shape index: {}]   ;;  %s2715_s4 = inlined_call_operand.vmem [shape: bf16[128,128], index: 4, kind: input, shape index: {}]   ;;  %s2716_s5 = inlined_call_operand.vmem [shape: f32[1,128], index: 5, kind: input, shape index: {}]   ;;  %s2717_s6 = inlined_call_operand.vmem [shape: f32[256,128], index: 6, kind: output, shape index: {}]  }
   0x1   :  { %s2203_s23 = smov 0  }
   0x2 LB: > { %s35_s24 = sadd.s32 1, %s2158_s22  ;;  %p1659_p0 = scmp.ge.s32.totalorder %s2162_s23, 1  ;;  %s2162_s23 = sphi %s2203_s23, %s16_s23   ;;  %s2158_s22 = sphi %s2201_s22, %s2719_s22   ;;  %s2154_s21 = sphi %s2199_s21, %s2718_s21  }
   0x3   : > { %p37_p1 = scmp.ge.s32.totalorder %s35_s24, 7  ;;  %p235_p2 = scmp.lt.s32.totalorder %s2162_s23, 8 }
   0x5   : > { %s2721_s24 = smov (%p37_p1, %s35_s24), 0  ;;  %p236_p3 = pnand %p1659_p0, %p235_p2 }
   0x6   : > { %p278_p4 = scmp.eq.s32.totalorder (!%p236_p3), %s2154_s21, 0 }
   0x7   : > { %239 = sbr.rel (%p236_p3) target bundleno = 875 (0x36b), region = 44 }
   0xe   : > { %286 = sbr.rel (!%p278_p4) target bundleno = 23 (0x17), region = 48  ;;  %v2060_v0 = vld [vmem:[%s2712_s1] sm:$0xff] (%p278_p4)   ;;  %v2061_v1 = vld [vmem:[%s2712_s1 + $0x8] sm:$0xff] (%p278_p4)   ;;  %v2062_v2 = vld [vmem:[%s2712_s1 + $0x10] sm:$0xff] (%p278_p4)  }
   0xf   : > { %415 = vst [vmem:[#allocation3] sm:$0xff] (%p278_p4), %v2060_v0  ;;  %416 = vst [vmem:[#allocation3 + $0x8] sm:$0xff] (%p278_p4), %v2061_v1  ;;  %v2063_v3 = vld [vmem:[%s2712_s1 + $0x18] sm:$0xff] (%p278_p4)   ;;  %v2064_v4 = vld [vmem:[%s2712_s1 + $0x20] sm:$0xff] (%p278_p4)  }
  0x10   : > { %417 = vst [vmem:[#allocation3 + $0x10] sm:$0xff] (%p278_p4), %v2062_v2  ;;  %418 = vst [vmem:[#allocation3 + $0x18] sm:$0xff] (%p278_p4), %v2063_v3  ;;  %v2065_v5 = vld [vmem:[%s2712_s1 + $0x28] sm:$0xff] (%p278_p4)   ;;  %v2066_v6 = vld [vmem:[%s2712_s1 + $0x30] sm:$0xff] (%p278_p4)  }
  0x11   : > { %419 = vst [vmem:[#allocation3 + $0x20] sm:$0xff] (%p278_p4), %v2064_v4  ;;  %420 = vst [vmem:[#allocation3 + $0x28] sm:$0xff] (%p278_p4), %v2065_v5  ;;  %v2067_v7 = vld [vmem:[%s2712_s1 + $0x38] sm:$0xff] (%p278_p4)   ;;  %v2068_v8 = vld [vmem:[%s2712_s1 + $0x40] sm:$0xff] (%p278_p4)  }
  0x12   : > { %421 = vst [vmem:[#allocation3 + $0x30] sm:$0xff] (%p278_p4), %v2066_v6  ;;  %422 = vst [vmem:[#allocation3 + $0x38] sm:$0xff] (%p278_p4), %v2067_v7  ;;  %v2069_v9 = vld [vmem:[%s2712_s1 + $0x48] sm:$0xff] (%p278_p4)   ;;  %v2070_v10 = vld [vmem:[%s2712_s1 + $0x50] sm:$0xff] (%p278_p4)  }
  0x13   : > { %423 = vst [vmem:[#allocation3 + $0x40] sm:$0xff] (%p278_p4), %v2068_v8  ;;  %424 = vst [vmem:[#allocation3 + $0x48] sm:$0xff] (%p278_p4), %v2069_v9  ;;  %v2071_v11 = vld [vmem:[%s2712_s1 + $0x58] sm:$0xff] (%p278_p4)   ;;  %v2072_v12 = vld [vmem:[%s2712_s1 + $0x60] sm:$0xff] (%p278_p4)  }
  0x14   : > { %425 = vst [vmem:[#allocation3 + $0x50] sm:$0xff] (%p278_p4), %v2070_v10  ;;  %426 = vst [vmem:[#allocation3 + $0x58] sm:$0xff] (%p278_p4), %v2071_v11  ;;  %v2073_v13 = vld [vmem:[%s2712_s1 + $0x68] sm:$0xff] (%p278_p4)   ;;  %v2074_v14 = vld [vmem:[%s2712_s1 + $0x70] sm:$0xff] (%p278_p4)  }
  0x15   : > { %427 = vst [vmem:[#allocation3 + $0x60] sm:$0xff] %v2072_v12  ;;  %428 = vst [vmem:[#allocation3 + $0x68] sm:$0xff] %v2073_v13  ;;  %v2075_v15 = vld [vmem:[%s2712_s1 + $0x78] sm:$0xff]  }
  0x16   : > { %429 = vst [vmem:[#allocation3 + $0x70] sm:$0xff] %v2074_v14  ;;  %430 = vst [vmem:[#allocation3 + $0x78] sm:$0xff] %v2075_v15 }
  0x17 PF: > { %p432_p5 = scmp.lt.s32.totalorder %s2154_s21, 0  ;;  %s433_s13 = ssub.s32 0, %s2154_s21  ;;  %v2078_v16 = vld [vmem:[%s2711_s0 + $0x4] ss:$8 sps:$4 sm:$0xff]   ;;  %v2076_v35 = vld [vmem:[%s2711_s0] ss:$8 sps:$4 sm:$0xff]  }
  0x18   : > { %s1678_s14 = smin.u32 %s2154_s21, %s433_s13  ;;  %690 = vmatprep.mubr.bf16.mxu0 %v2078_v16  ;;  %v2108_v24 = vld [vmem:[%s2711_s0 + $0xc4] ss:$8 sps:$4 sm:$0xff]   ;;  %s1746_s28 = sshll.u32 %s2154_s21, 6  ;;  %v2106_v36 = vld [vmem:[%s2711_s0 + $0xc0] ss:$8 sps:$4 sm:$0xff]  }
  0x19   : > { %s435_s17 = sand.u32 1, %s1678_s14   ;;  %786 = vmatprep.mubr.bf16.mxu1 %v2108_v24  ;;  %s2292_s7 = scalar_lea.vmem %s2713_s2, %s1746_s28  ;;  %v2079_v37 = vld [vmem:[%s2711_s0 + $0x14] ss:$8 sps:$4 sm:$0xff]   ;;  %v2081_v41 = vld [vmem:[%s2711_s0 + $0x10] ss:$8 sps:$4 sm:$0xff]  }
  0x1a   : > { %s436_s18 = ssub.s32 0, %s435_s17  ;;  %v2124_v34 = vld [vmem:[%s2292_s7] sm:$0xff]   ;;  %v2112_v38 = vld [vmem:[%s2711_s0 + $0xd4] ss:$8 sps:$4 sm:$0xff]   ;;  %v2125_v39 = vld [vmem:[%s2292_s7 + $0x8] sm:$0xff]   ;;  %p1731_p9 = scmp.ne.s32.totalorder %s2154_s21, 6 }
  0x1b   : > { %s2723_s18 = smov (!%p432_p5, %s436_s18), %s435_s17  ;;  %v2126_v40 = vld [vmem:[%s2292_s7 + $0x10] sm:$0xff]   ;;  %v2082_v43 = vld [vmem:[%s2711_s0 + $0x24] ss:$8 sps:$4 sm:$0xff]   ;;  %v2127_v45 = vld [vmem:[%s2292_s7 + $0x18] sm:$0xff]   ;;  %s1025_s17 = scalar_lea.vmem %s2714_s3, %s2154_s21 }
  0x1c   : > { %p1680_p6 = scmp.lt.s32.totalorder %s2723_s18, 0  ;;  %s442_s19 = sadd.s32 2, %s2723_s18  ;;  %v2114_v42 = vld [vmem:[%s2711_s0 + $0xd0] ss:$8 sps:$4 sm:$0xff]   ;;  %v2118_v44 = vld [vmem:[%s2711_s0 + $0xe4] ss:$8 sps:$4 sm:$0xff]  }
  0x1d   : > { %v2084_v46 = vld [vmem:[%s2711_s0 + $0x20] ss:$8 sps:$4 sm:$0xff]   ;;  %v2085_v48 = vld [vmem:[%s2711_s0 + $0x34] ss:$8 sps:$4 sm:$0xff]   ;;  %v2087_v50 = vld [vmem:[%s2711_s0 + $0x30] ss:$8 sps:$4 sm:$0xff]  }
  0x1e   : > { %s2725_s19 = smov (!%p1680_p6, %s442_s19), %s2723_s18  ;;  %v2120_v47 = vld [vmem:[%s2711_s0 + $0xe0] ss:$8 sps:$4 sm:$0xff]   ;;  %v2121_v49 = vld [vmem:[%s2711_s0 + $0xf4] ss:$8 sps:$4 sm:$0xff]   ;;  %v2123_v51 = vld [vmem:[%s2711_s0 + $0xf0] ss:$8 sps:$4 sm:$0xff]  }
  0x1f   : > { %s1745_s20 = sshll.u32 %s2725_s19, 7  ;;  %v2088_v52 = vld [vmem:[%s2711_s0 + $0x44] ss:$8 sps:$4 sm:$0xff]   ;;  %v2090_v53 = vld [vmem:[%s2711_s0 + $0x40] ss:$8 sps:$4 sm:$0xff]   ;;  %v2130_v6 = vld [vmem:[%s2292_s7 + $0x30] sm:$0xff]  }
  0x20   : > { %s2274_s25 = scalar_lea.vmem [#allocation3], %s1745_s20  ;;  %v2091_v54 = vld [vmem:[%s2711_s0 + $0x54] ss:$8 sps:$4 sm:$0xff]   ;;  %v2093_v55 = vld [vmem:[%s2711_s0 + $0x50] ss:$8 sps:$4 sm:$0xff]   ;;  %v2128_v3 = vld [vmem:[%s2292_s7 + $0x20] sm:$0xff]  }
  0x21   : > { %v458_v17 = vld [vmem:[%s2274_s25 + $0x40] sm:$0xff]  ;;  %v459_v19 = vld [vmem:[%s2274_s25 + $0x48] sm:$0xff]  ;;  %v460_v21 = vld [vmem:[%s2274_s25 + $0x50] sm:$0xff] }
  0x22   : > { %v450_v18 = vld [vmem:[%s2274_s25] sm:$0xff]  ;;  %1748 = vmatprep.subr.bf16.mxu0 %v458_v17  ;;  %2004 = vmatprep.subr.bf16.mxu1 %v458_v17  ;;  %v451_v20 = vld [vmem:[%s2274_s25 + $0x8] sm:$0xff]  ;;  %v452_v22 = vld [vmem:[%s2274_s25 + $0x10] sm:$0xff] }
  0x23   : > { %1749 = vmatpush3.bf16.msra.mxu0 %v450_v18  ;;  %2012 = vmatpush3.bf16.msra.mxu1 %v450_v18  ;;  %v461_v23 = vld [vmem:[%s2274_s25 + $0x58] sm:$0xff]  ;;  %v462_v26 = vld [vmem:[%s2274_s25 + $0x60] sm:$0xff]  ;;  %v463_v28 = vld [vmem:[%s2274_s25 + $0x68] sm:$0xff] }
  0x24   : > { %1750 = vmatprep.subr.bf16.mxu0 %v459_v19  ;;  %2005 = vmatprep.subr.bf16.mxu1 %v459_v19  ;;  %v453_v25 = vld [vmem:[%s2274_s25 + $0x18] sm:$0xff]  ;;  %v454_v27 = vld [vmem:[%s2274_s25 + $0x20] sm:$0xff]  ;;  %v455_v29 = vld [vmem:[%s2274_s25 + $0x28] sm:$0xff] }
  0x25   : > { %v464_v30 = vld [vmem:[%s2274_s25 + $0x70] sm:$0xff]  ;;  %v465_v32 = vld [vmem:[%s2274_s25 + $0x78] sm:$0xff]  ;;  %v2094_v56 = vld [vmem:[%s2711_s0 + $0x64] ss:$8 sps:$4 sm:$0xff]  }
  0x26   : > { %v456_v31 = vld [vmem:[%s2274_s25 + $0x30] sm:$0xff]  ;;  %v457_v33 = vld [vmem:[%s2274_s25 + $0x38] sm:$0xff]  ;;  %v2096_v57 = vld [vmem:[%s2711_s0 + $0x60] ss:$8 sps:$4 sm:$0xff]  }
  0x27   : > { %1751 = vmatpush3.bf16.msra.mxu0 %v451_v20  ;;  %2013 = vmatpush3.bf16.msra.mxu1 %v451_v20  ;;  %v2097_v58 = vld [vmem:[%s2711_s0 + $0x74] ss:$8 sps:$4 sm:$0xff]   ;;  %v2099_v59 = vld [vmem:[%s2711_s0 + $0x70] ss:$8 sps:$4 sm:$0xff]   ;;  %v2100_v60 = vld [vmem:[%s2711_s0 + $0x84] ss:$8 sps:$4 sm:$0xff]  }
  0x28   : > { %1752 = vmatprep.subr.bf16.mxu0 %v460_v21  ;;  %2006 = vmatprep.subr.bf16.mxu1 %v460_v21  ;;  %v2102_v61 = vld [vmem:[%s2711_s0 + $0x80] ss:$8 sps:$4 sm:$0xff]   ;;  %v2103_v62 = vld [vmem:[%s2711_s0 + $0x94] ss:$8 sps:$4 sm:$0xff]   ;;  %v2105_v63 = vld [vmem:[%s2711_s0 + $0x90] ss:$8 sps:$4 sm:$0xff]  }
  0x29   : > { %v2109_v0 = vld [vmem:[%s2711_s0 + $0xa4] ss:$8 sps:$4 sm:$0xff]   ;;  %v2111_v1 = vld [vmem:[%s2711_s0 + $0xa0] ss:$8 sps:$4 sm:$0xff]   ;;  %v2115_v2 = vld [vmem:[%s2711_s0 + $0xb4] ss:$8 sps:$4 sm:$0xff]  }
  0x2a   : > { %v2117_v4 = vld [vmem:[%s2711_s0 + $0xb0] ss:$8 sps:$4 sm:$0xff]   ;;  %v2129_v5 = vld [vmem:[%s2292_s7 + $0x28] sm:$0xff]  }
  0x2b   : > { %1753 = vmatpush3.bf16.msra.mxu0 %v452_v22  ;;  %2014 = vmatpush3.bf16.msra.mxu1 %v452_v22  ;;  %v2131_v7 = vld [vmem:[%s2292_s7 + $0x38] sm:$0xff]   ;;  %s1290_s7 = sadd.s32 1, %s2154_s21 }
  0x2c   : > { %1754 = vmatprep.subr.bf16.mxu0 %v461_v23  ;;  %2007 = vmatprep.subr.bf16.mxu1 %v461_v23  ;;  %s1292_s11 = ssub.s32 0, %s1290_s7  ;;  %p1291_p7 = scmp.lt.s32.totalorder %s1290_s7, 0 }
  0x2d   : > { %s1726_s12 = smin.u32 %s1292_s11, %s1290_s7 }
  0x2e   : > { %s1294_s13 = sand.u32 1, %s1726_s12  }
  0x2f   : > { %1755 = vmatpush3.bf16.msra.mxu0 %v453_v25  ;;  %2015 = vmatpush3.bf16.msra.mxu1 %v453_v25  ;;  %s1295_s14 = ssub.s32 0, %s1294_s13 }
  0x30   : > { %1756 = vmatprep.subr.bf16.mxu0 %v462_v26  ;;  %2008 = vmatprep.subr.bf16.mxu1 %v462_v26  ;;  %s2727_s14 = smov (!%p1291_p7, %s1295_s14), %s1294_s13 }
  0x31   : > { %p1728_p8 = scmp.lt.s32.totalorder %s2727_s14, 0  ;;  %s1301_s18 = sadd.s32 2, %s2727_s14 }
  0x33   : > { %1757 = vmatpush3.bf16.msra.mxu0 %v454_v27  ;;  %2016 = vmatpush3.bf16.msra.mxu1 %v454_v27  ;;  %s2729_s18 = smov (!%p1728_p8, %s1301_s18), %s2727_s14 }
  0x34   : > { %1758 = vmatprep.subr.bf16.mxu0 %v463_v28  ;;  %2009 = vmatprep.subr.bf16.mxu1 %v463_v28  ;;  %s1747_s19 = sshll.u32 %s2729_s18, 7 }
  0x35   : > { %s2450_s20 = scalar_lea.vmem [#allocation3], %s1747_s19 }
  0x37   : > { %1759 = vmatpush3.bf16.msra.mxu0 %v455_v29  ;;  %2017 = vmatpush3.bf16.msra.mxu1 %v455_v29 }
  0x38   : > { %1760 = vmatprep.subr.bf16.mxu0 %v464_v30  ;;  %2010 = vmatprep.subr.bf16.mxu1 %v464_v30 }
  0x3b   : > { %1761 = vmatpush3.bf16.msra.mxu0 %v456_v31  ;;  %2018 = vmatpush3.bf16.msra.mxu1 %v456_v31 }
  0x3c   : > { %1762 = vmatprep.subr.bf16.mxu0 %v465_v32  ;;  %2011 = vmatprep.subr.bf16.mxu1 %v465_v32 }
  0x3f   : > { %1763 = vmatpush3.bf16.msra.mxu0 %v457_v33  ;;  %2019 = vmatpush3.bf16.msra.mxu1 %v457_v33 }
  0x40   : > { %1908 = vmatprep.subr.bf16.mxu1 %v2124_v34 }
  0x42   : > { %691 = vmatmul.mubr.bf16.vlgmr.msra.gmra.mrb[0].mxu0 %v2076_v35  ;;  %787 = vmatmul.mubr.bf16.vlgmr.msra.gmra.mrb[0].mxu1 %v2106_v36 }
  0x43   : > { %698 = vmatprep.mubr.bf16.mxu0 %v2079_v37  ;;  %794 = vmatprep.mubr.bf16.mxu1 %v2112_v38 }
  0x44   : > { %1909 = vmatpush3.bf16.msra.mxu1 %v2124_v34 }
  0x45   : > { %1910 = vmatprep.subr.bf16.mxu1 %v2125_v39 }
  0x48   : > { %1911 = vmatpush3.bf16.msra.mxu1 %v2125_v39 }
  0x49   : > { %1912 = vmatprep.subr.bf16.mxu1 %v2126_v40 }
  0x4a   : > { %699 = vmatmul.mubr.bf16.gmra.mrb[4].mxu0 %v2081_v41  ;;  %795 = vmatmul.mubr.bf16.gmra.mrb[4].mxu1 %v2114_v42 }
  0x4b   : > { %706 = vmatprep.mubr.bf16.mxu0 %v2082_v43  ;;  %802 = vmatprep.mubr.bf16.mxu1 %v2118_v44 }
  0x4c   : > { %1913 = vmatpush3.bf16.msra.mxu1 %v2126_v40 }
  0x4d   : > { %1914 = vmatprep.subr.bf16.mxu1 %v2127_v45 }
  0x50   : > { %1915 = vmatpush3.bf16.msra.mxu1 %v2127_v45 }
  0x51   : > { %1916 = vmatprep.subr.bf16.mxu1 %v2128_v3 }
  0x52   : > { %707 = vmatmul.mubr.bf16.gmra.mrb[8].mxu0 %v2084_v46  ;;  %803 = vmatmul.mubr.bf16.gmra.mrb[8].mxu1 %v2120_v47 }
  0x53   : > { %714 = vmatprep.mubr.bf16.mxu0 %v2085_v48  ;;  %810 = vmatprep.mubr.bf16.mxu1 %v2121_v49 }
  0x54   : > { %1917 = vmatpush3.bf16.msra.mxu1 %v2128_v3 }
  0x55   : > { %1918 = vmatprep.subr.bf16.mxu1 %v2129_v5 }
  0x58   : > { %1919 = vmatpush3.bf16.msra.mxu1 %v2129_v5 }
  0x59   : > { %1920 = vmatprep.subr.bf16.mxu1 %v2130_v6 }
  0x5a   : > { %715 = vmatmul.mubr.bf16.gmra.mrb[12].mxu0 %v2087_v50  ;;  %811 = vmatmul.mubr.bf16.gmra.mrb[12].mxu1 %v2123_v51 }
  0x5b   : > { %722 = vmatprep.mubr.bf16.mxu0 %v2088_v52 }
  0x5c   : > { %1921 = vmatpush3.bf16.msra.mxu1 %v2130_v6 }
  0x5d   : > { %1922 = vmatprep.subr.bf16.mxu1 %v2131_v7 }
  0x60   : > { %1923 = vmatpush3.bf16.msra.mxu1 %v2131_v7 }
  0x62   : > { %723 = vmatmul.mubr.bf16.gmra.mrb[16].mxu0 %v2090_v53 }
  0x63   : > { %730 = vmatprep.mubr.bf16.mxu0 %v2091_v54 }
  0x6a   : > { %731 = vmatmul.mubr.bf16.gmra.mrb[20].mxu0 %v2093_v55 }
  0x6b   : > { %738 = vmatprep.mubr.bf16.mxu0 %v2094_v56 }
  0x72   : > { %739 = vmatmul.mubr.bf16.gmra.mrb[24].mxu0 %v2096_v57 }
  0x73   : > { %746 = vmatprep.mubr.bf16.mxu0 %v2097_v58 }
  0x7a   : > { %747 = vmatmul.mubr.bf16.gmra.mrb[28].mxu0 %v2099_v59 }
  0x7b   : > { %754 = vmatprep.mubr.bf16.mxu0 %v2100_v60 }
  0x82   : > { %755 = vmatmul.mubr.bf16.gmra.mrb[32].mxu0 %v2102_v61 }
  0x83   : > { %762 = vmatprep.mubr.bf16.mxu0 %v2103_v62 }
  0x8a   : > { %763 = vmatmul.mubr.bf16.gmra.mrb[36].mxu0 %v2105_v63 }
  0x8b   : > { %770 = vmatprep.mubr.bf16.mxu0 %v2109_v0 }
  0x92   : > { %771 = vmatmul.mubr.bf16.gmra.mrb[40].mxu0 %v2111_v1 }
  0x93   : > { %778 = vmatprep.mubr.bf16.mxu0 %v2115_v2 }
  0x9a   : > { %779 = vmatmul.mubr.bf16.gmra.mrb[44].mxu0 %v2117_v4 }
 0x115   : > { %v1764_v8 = vpop.f32.mrb[0].mxu0  ;;  %v1836_v9 = vpop.f32.mrb[0].mxu1 }
 0x116   : > { %v1765_v10 = vpop.f32.mrb[1].mxu0  ;;  %v1837_v11 = vpop.f32.mrb[1].mxu1 }
 0x117   : > { %v1766_v12 = vadd.f32 %v1765_v10, %v1764_v8  ;;  %v1767_v13 = vpop.f32.mrb[2].mxu0  ;;  %v2399_v14 = vadd.f32 %v1837_v11, %v1836_v9  ;;  %v1839_v15 = vpop.f32.mrb[2].mxu1 }
 0x118   : > { %v1768_v16 = vpop.f32.mrb[3].mxu0  ;;  %v1840_v17 = vpop.f32.mrb[3].mxu1 }
 0x119   : > { %v1769_v18 = vadd.f32 %v1768_v16, %v1767_v13  ;;  %v2401_v19 = vadd.f32 %v1840_v17, %v1839_v15 }
 0x11b   : > { %v990_v20 = vpack.c.bf16 %v1769_v18, %v1766_v12  ;;  %v1002_v21 = vpack.c.bf16 %v2401_v19, %v2399_v14  ;;  %v2440_v14 = vld [vmem:[%s1025_s17] ss:$0 sm:$0xff] }
 0x11d   : > { %v1770_v22 = vpop.f32.mrb[4].mxu0  ;;  %1924 = vmatprep.mubr.bf16.mxu1 %v990_v20  ;;  %v1842_v23 = vpop.f32.mrb[4].mxu1 }
 0x11e   : > { %v1771_v24 = vpop.f32.mrb[5].mxu0  ;;  %v1843_v25 = vpop.f32.mrb[5].mxu1 }
 0x11f   : > { %v1772_v26 = vadd.f32 %v1771_v24, %v1770_v22  ;;  %v1773_v27 = vpop.f32.mrb[6].mxu0  ;;  %v2405_v28 = vadd.f32 %v1843_v25, %v1842_v23  ;;  %v1845_v29 = vpop.f32.mrb[6].mxu1 }
 0x120   : > { %v1774_v30 = vpop.f32.mrb[7].mxu0  ;;  %v1846_v31 = vpop.f32.mrb[7].mxu1 }
 0x121   : > { %v1775_v32 = vadd.f32 %v1774_v30, %v1773_v27  ;;  %v2407_v33 = vadd.f32 %v1846_v31, %v1845_v29 }
 0x123   : > { %v991_v34 = vpack.c.bf16 %v1775_v32, %v1772_v26  ;;  %v1003_v35 = vpack.c.bf16 %v2407_v33, %v2405_v28 }
 0x125   : > { %v1776_v36 = vpop.f32.mrb[8].mxu0  ;;  %1925 = vmatmul.mubr.bf16.vlgmr.msra.gmra.mrb[16].mxu1 %v991_v34  ;;  %v1848_v37 = vpop.f32.mrb[8].mxu1 }
 0x126   : > { %v1777_v38 = vpop.f32.mrb[9].mxu0  ;;  %v1849_v39 = vpop.f32.mrb[9].mxu1 }
 0x127   : > { %v1778_v40 = vadd.f32 %v1777_v38, %v1776_v36  ;;  %v1779_v41 = vpop.f32.mrb[10].mxu0  ;;  %v2411_v42 = vadd.f32 %v1849_v39, %v1848_v37  ;;  %v1851_v43 = vpop.f32.mrb[10].mxu1 }
 0x128   : > { %v1780_v44 = vpop.f32.mrb[11].mxu0  ;;  %v1852_v45 = vpop.f32.mrb[11].mxu1 }
 0x129   : > { %v1781_v46 = vadd.f32 %v1780_v44, %v1779_v41  ;;  %v2413_v47 = vadd.f32 %v1852_v45, %v1851_v43 }
 0x12b   : > { %v992_v48 = vpack.c.bf16 %v1781_v46, %v1778_v40  ;;  %v1004_v49 = vpack.c.bf16 %v2413_v47, %v2411_v42 }
 0x12d   : > { %v1782_v50 = vpop.f32.mrb[12].mxu0  ;;  %1928 = vmatprep.mubr.bf16.mxu1 %v992_v48  ;;  %v1854_v51 = vpop.f32.mrb[12].mxu1 }
 0x12e   : > { %v1783_v52 = vpop.f32.mrb[13].mxu0  ;;  %v1855_v53 = vpop.f32.mrb[13].mxu1 }
 0x12f   : > { %v1784_v54 = vadd.f32 %v1783_v52, %v1782_v50  ;;  %v1785_v55 = vpop.f32.mrb[14].mxu0  ;;  %v2417_v56 = vadd.f32 %v1855_v53, %v1854_v51  ;;  %v1857_v57 = vpop.f32.mrb[14].mxu1 }
 0x130   : > { %v1786_v58 = vpop.f32.mrb[15].mxu0  ;;  %v1858_v59 = vpop.f32.mrb[15].mxu1 }
 0x131   : > { %v1787_v60 = vadd.f32 %v1786_v58, %v1785_v55  ;;  %v2419_v61 = vadd.f32 %v1858_v59, %v1857_v57 }
 0x133   : > { %v993_v62 = vpack.c.bf16 %v1787_v60, %v1784_v54  ;;  %v1005_v63 = vpack.c.bf16 %v2419_v61, %v2417_v56 }
 0x135   : > { %v1788_v0 = vpop.f32.mrb[16].mxu0  ;;  %1929 = vmatmul.mubr.bf16.gmra.mrb[20].mxu1 %v993_v62 }
 0x136   : > { %v1789_v1 = vpop.f32.mrb[17].mxu0 }
 0x137   : > { %v1790_v2 = vadd.f32 %v1789_v1, %v1788_v0  ;;  %v1791_v3 = vpop.f32.mrb[18].mxu0 }
 0x138   : > { %v1792_v4 = vpop.f32.mrb[19].mxu0 }
 0x139   : > { %v1793_v5 = vadd.f32 %v1792_v4, %v1791_v3 }
 0x13b   : > { %v994_v6 = vpack.c.bf16 %v1793_v5, %v1790_v2 }
 0x13d   : > { %v1794_v7 = vpop.f32.mrb[20].mxu0  ;;  %1932 = vmatprep.mubr.bf16.mxu1 %v994_v6 }
 0x13e   : > { %v1795_v8 = vpop.f32.mrb[21].mxu0 }
 0x13f   : > { %v1796_v9 = vadd.f32 %v1795_v8, %v1794_v7  ;;  %v1797_v10 = vpop.f32.mrb[22].mxu0 }
 0x140   : > { %v1798_v11 = vpop.f32.mrb[23].mxu0 }
 0x141   : > { %v1799_v12 = vadd.f32 %v1798_v11, %v1797_v10 }
 0x143   : > { %v995_v13 = vpack.c.bf16 %v1799_v12, %v1796_v9 }
 0x145   : > { %v1800_v15 = vpop.f32.mrb[24].mxu0  ;;  %1933 = vmatmul.mubr.bf16.gmra.mrb[24].mxu1 %v995_v13 }
 0x146   : > { %v1801_v16 = vpop.f32.mrb[25].mxu0 }
 0x147   : > { %v1802_v17 = vadd.f32 %v1801_v16, %v1800_v15  ;;  %v1803_v18 = vpop.f32.mrb[26].mxu0 }
 0x148   : > { %v1804_v20 = vpop.f32.mrb[27].mxu0 }
 0x149   : > { %v1805_v22 = vadd.f32 %v1804_v20, %v1803_v18 }
 0x14b   : > { %v996_v23 = vpack.c.bf16 %v1805_v22, %v1802_v17 }
 0x14d   : > { %v1806_v24 = vpop.f32.mrb[28].mxu0  ;;  %1936 = vmatprep.mubr.bf16.mxu1 %v996_v23 }
 0x14e   : > { %v1807_v25 = vpop.f32.mrb[29].mxu0 }
 0x14f   : > { %v1808_v26 = vadd.f32 %v1807_v25, %v1806_v24  ;;  %v1809_v27 = vpop.f32.mrb[30].mxu0 }
 0x150   : > { %v1810_v29 = vpop.f32.mrb[31].mxu0 }
 0x151   : > { %v1811_v30 = vadd.f32 %v1810_v29, %v1809_v27 }
 0x153   : > { %v997_v31 = vpack.c.bf16 %v1811_v30, %v1808_v26 }
 0x155   : > { %v1812_v32 = vpop.f32.mrb[32].mxu0  ;;  %1937 = vmatmul.mubr.bf16.gmra.mrb[28].mxu1 %v997_v31 }
 0x156   : > { %v1813_v34 = vpop.f32.mrb[33].mxu0 }
 0x157   : > { %v1814_v36 = vadd.f32 %v1813_v34, %v1812_v32  ;;  %v1815_v37 = vpop.f32.mrb[34].mxu0 }
 0x158   : > { %v1816_v38 = vpop.f32.mrb[35].mxu0 }
 0x159   : > { %v1817_v39 = vadd.f32 %v1816_v38, %v1815_v37 }
 0x15b   : > { %v998_v40 = vpack.c.bf16 %v1817_v39, %v1814_v36 }
 0x15d   : > { %v1818_v41 = vpop.f32.mrb[36].mxu0  ;;  %1940 = vmatprep.mubr.bf16.mxu1 %v998_v40 }
 0x15e   : > { %v1819_v43 = vpop.f32.mrb[37].mxu0 }
 0x15f   : > { %v1820_v44 = vadd.f32 %v1819_v43, %v1818_v41  ;;  %v1821_v45 = vpop.f32.mrb[38].mxu0 }
 0x160   : > { %v1822_v46 = vpop.f32.mrb[39].mxu0 }
 0x161   : > { %v1823_v48 = vadd.f32 %v1822_v46, %v1821_v45 }
 0x163   : > { %v999_v50 = vpack.c.bf16 %v1823_v48, %v1820_v44 }
 0x165   : > { %v1824_v51 = vpop.f32.mrb[40].mxu0  ;;  %1941 = vmatmul.mubr.bf16.gmra.mrb[32].mxu1 %v999_v50 }
 0x166   : > { %v1825_v52 = vpop.f32.mrb[41].mxu0 }
 0x167   : > { %v1826_v53 = vadd.f32 %v1825_v52, %v1824_v51  ;;  %v1827_v54 = vpop.f32.mrb[42].mxu0 }
 0x168   : > { %v1828_v55 = vpop.f32.mrb[43].mxu0 }
 0x169   : > { %v1829_v57 = vadd.f32 %v1828_v55, %v1827_v54 }
 0x16b   : > { %v1000_v58 = vpack.c.bf16 %v1829_v57, %v1826_v53 }
 0x16d   : > { %v1830_v59 = vpop.f32.mrb[44].mxu0  ;;  %1944 = vmatprep.mubr.bf16.mxu1 %v1000_v58 }
 0x16e   : > { %v1831_v60 = vpop.f32.mrb[45].mxu0 }
 0x16f   : > { %v1832_v62 = vadd.f32 %v1831_v60, %v1830_v59  ;;  %v1833_v0 = vpop.f32.mrb[46].mxu0 }
 0x170   : > { %v1834_v1 = vpop.f32.mrb[47].mxu0 }
 0x171   : > { %v1835_v2 = vadd.f32 %v1834_v1, %v1833_v0 }
 0x173   : > { %v1001_v3 = vpack.c.bf16 %v1835_v2, %v1832_v62 }
 0x175   : > { %1945 = vmatmul.mubr.bf16.gmra.mrb[36].mxu1 %v1001_v3 }
 0x176   : > { %1948 = vmatprep.mubr.bf16.mxu1 %v1002_v21 }
 0x17d   : > { %1949 = vmatmul.mubr.bf16.gmra.mrb[40].mxu1 %v1003_v35 }
 0x17e   : > { %1952 = vmatprep.mubr.bf16.mxu1 %v1004_v49 }
 0x185   : > { %1953 = vmatmul.mubr.bf16.gmra.mrb[44].mxu1 %v1005_v63 }
 0x1f8   : > { %v1926_v19 = vpop.f32.mrb[16].mxu1 }
 0x1f9   : > { %v1124_v21 = vadd.f32 %v1926_v19, %v2440_v14  ;;  %v1115_v28 = vpop.f32.mrb[17].mxu1 }
 0x1fa   : > { %v1116_v33 = vadd.f32 %v2440_v14, %v1115_v28  ;;  %v1927_v35 = vpop.f32.mrb[18].mxu1 }
 0x1fb   : > { %v1127_v42 = vadd.f32 %v1927_v35, %v2440_v14  ;;  %v1118_v47 = vpop.f32.mrb[19].mxu1  ;;  %v1244_v56 = vmax.f32 %v1124_v21, 0.0 }
 0x1fc   : > { %v1119_v49 = vadd.f32 %v2440_v14, %v1118_v47  ;;  %v1242_v63 = vmax.f32 %v1116_v33, 0.0 }
 0x1fd   : > { %v1245_v61 = vmax.f32 %v1127_v42, 0.0 }
 0x1fe   : > { %v1243_v4 = vmax.f32 %v1119_v49, 0.0 }
 0x1ff   : > { %v2446_v5 = vpack.c.bf16 %v1245_v61, %v1244_v56 }
 0x200   : > { %v2448_v6 = vpack.c.bf16 %v1243_v4, %v1242_v63 }
 0x201   : > { %1310 = vst [vmem:[%s2450_s20 + $0x8] sm:$0xff] %v2446_v5 }
 0x202   : > { %1309 = vst [vmem:[%s2450_s20] sm:$0xff] %v2448_v6  ;;  %1972 = vmatprep.mubr.bf16.mxu0 (!%p1731_p9), %v2448_v6  ;;  %v2135_v6 = vld [vmem:[%s2715_s4 + $0x18] sm:$0xff] (!%p1731_p9)  }
 0x208   : > { %v1930_v7 = vpop.f32.mrb[20].mxu1 }
 0x209   : > { %v1140_v8 = vadd.f32 %v1930_v7, %v2440_v14  ;;  %v1131_v9 = vpop.f32.mrb[21].mxu1 }
 0x20a   : > { %v1132_v10 = vadd.f32 %v2440_v14, %v1131_v9  ;;  %v1931_v11 = vpop.f32.mrb[22].mxu1 }
 0x20b   : > { %v1143_v12 = vadd.f32 %v1931_v11, %v2440_v14  ;;  %v1134_v13 = vpop.f32.mrb[23].mxu1  ;;  %v1248_v16 = vmax.f32 %v1140_v8, 0.0 }
 0x20c   : > { %v1135_v15 = vadd.f32 %v2440_v14, %v1134_v13  ;;  %v1246_v18 = vmax.f32 %v1132_v10, 0.0 }
 0x20d   : > { %v1249_v17 = vmax.f32 %v1143_v12, 0.0 }
 0x20e   : > { %v1247_v20 = vmax.f32 %v1135_v15, 0.0 }
 0x20f   : > { %v2460_v22 = vpack.c.bf16 %v1249_v17, %v1248_v16 }
 0x210   : > { %v2462_v23 = vpack.c.bf16 %v1247_v20, %v1246_v18 }
 0x211   : > { %1312 = vst [vmem:[%s2450_s20 + $0x18] sm:$0xff] %v2460_v22 }
 0x212   : > { %1311 = vst [vmem:[%s2450_s20 + $0x10] sm:$0xff] %v2462_v23 }
 0x218   : > { %v1934_v24 = vpop.f32.mrb[24].mxu1 }
 0x219   : > { %v1156_v25 = vadd.f32 %v1934_v24, %v2440_v14  ;;  %v1147_v26 = vpop.f32.mrb[25].mxu1 }
 0x21a   : > { %v1148_v27 = vadd.f32 %v2440_v14, %v1147_v26  ;;  %v1935_v29 = vpop.f32.mrb[26].mxu1 }
 0x21b   : > { %v1159_v30 = vadd.f32 %v1935_v29, %v2440_v14  ;;  %v1150_v31 = vpop.f32.mrb[27].mxu1  ;;  %v1252_v34 = vmax.f32 %v1156_v25, 0.0 }
 0x21c   : > { %v1151_v32 = vadd.f32 %v2440_v14, %v1150_v31  ;;  %v1250_v37 = vmax.f32 %v1148_v27, 0.0 }
 0x21d   : > { %v1253_v36 = vmax.f32 %v1159_v30, 0.0 }
 0x21e   : > { %v1251_v38 = vmax.f32 %v1151_v32, 0.0 }
 0x21f   : > { %v2472_v39 = vpack.c.bf16 %v1253_v36, %v1252_v34 }
 0x220   : > { %v2474_v40 = vpack.c.bf16 %v1251_v38, %v1250_v37 }
 0x221   : > { %1314 = vst [vmem:[%s2450_s20 + $0x28] sm:$0xff] %v2472_v39 }
 0x222   : > { %1313 = vst [vmem:[%s2450_s20 + $0x20] sm:$0xff] %v2474_v40 }
 0x228   : > { %v1938_v41 = vpop.f32.mrb[28].mxu1 }
 0x229   : > { %v1172_v43 = vadd.f32 %v1938_v41, %v2440_v14  ;;  %v1163_v44 = vpop.f32.mrb[29].mxu1 }
 0x22a   : > { %v1164_v45 = vadd.f32 %v2440_v14, %v1163_v44  ;;  %v1939_v46 = vpop.f32.mrb[30].mxu1 }
 0x22b   : > { %v1175_v48 = vadd.f32 %v1939_v46, %v2440_v14  ;;  %v1166_v50 = vpop.f32.mrb[31].mxu1  ;;  %v1256_v52 = vmax.f32 %v1172_v43, 0.0 }
 0x22c   : > { %v1167_v51 = vadd.f32 %v2440_v14, %v1166_v50  ;;  %v1254_v54 = vmax.f32 %v1164_v45, 0.0 }
 0x22d   : > { %v1257_v53 = vmax.f32 %v1175_v48, 0.0 }
 0x22e   : > { %v1255_v55 = vmax.f32 %v1167_v51, 0.0 }
 0x22f   : > { %v2484_v57 = vpack.c.bf16 %v1257_v53, %v1256_v52 }
 0x230   : > { %v2486_v58 = vpack.c.bf16 %v1255_v55, %v1254_v54 }
 0x231   : > { %1316 = vst [vmem:[%s2450_s20 + $0x38] sm:$0xff] %v2484_v57 }
 0x232   : > { %1315 = vst [vmem:[%s2450_s20 + $0x30] sm:$0xff] %v2486_v58 }
 0x238   : > { %v1942_v59 = vpop.f32.mrb[32].mxu1 }
 0x239   : > { %v1188_v60 = vadd.f32 %v1942_v59, %v2440_v14  ;;  %v1179_v62 = vpop.f32.mrb[33].mxu1 }
 0x23a   : > { %v1180_v0 = vadd.f32 %v2440_v14, %v1179_v62  ;;  %v1943_v1 = vpop.f32.mrb[34].mxu1  ;;  %v2134_v62 = vld [vmem:[%s2715_s4 + $0x10] sm:$0xff] (!%p1731_p9)  }
 0x23b   : > { %v1191_v2 = vadd.f32 %v1943_v1, %v2440_v14  ;;  %v1182_v3 = vpop.f32.mrb[35].mxu1  ;;  %v1260_v21 = vmax.f32 %v1188_v60, 0.0  ;;  %v2132_v60 = vld [vmem:[%s2715_s4] sm:$0xff] (!%p1731_p9)   ;;  %v2137_v1 = vld [vmem:[%s2715_s4 + $0x28] sm:$0xff] (!%p1731_p9)  }
 0x23c   : > { %v1183_v19 = vadd.f32 %v2440_v14, %v1182_v3  ;;  %v1258_v33 = vmax.f32 %v1180_v0, 0.0  ;;  %1956 = vmatprep.subr.bf16.mxu0 (!%p1731_p9), %v2132_v60  ;;  %2020 = vmatprep.subr.bf16.mxu1 (!%p1731_p9), %v2132_v60  ;;  %v2136_v0 = vld [vmem:[%s2715_s4 + $0x20] sm:$0xff] (!%p1731_p9)   ;;  %v2139_v3 = vld [vmem:[%s2715_s4 + $0x38] sm:$0xff] (!%p1731_p9)  }
 0x23d   : > { %v1261_v28 = vmax.f32 %v1191_v2, 0.0  ;;  %1957 = vmatpush3.bf16.msra.mxu0 (!%p1731_p9), %v2132_v60  ;;  %2028 = vmatpush3.bf16.msra.mxu1 (!%p1731_p9), %v2132_v60  ;;  %v2138_v2 = vld [vmem:[%s2715_s4 + $0x30] sm:$0xff] (!%p1731_p9)  }
 0x23e   : > { %v1259_v35 = vmax.f32 %v1183_v19, 0.0 }
 0x23f   : > { %v2496_v42 = vpack.c.bf16 %v1261_v28, %v1260_v21 }
 0x240   : > { %v1282_v47 = vpack.c.bf16 %v1259_v35, %v1258_v33 }
 0x241   : > { %1318 = vst [vmem:[%s2450_s20 + $0x48] sm:$0xff] %v2496_v42 }
 0x242   : > { %1317 = vst [vmem:[%s2450_s20 + $0x40] sm:$0xff] %v1282_v47  ;;  %1988 = vmatprep.mubr.bf16.mxu1 (!%p1731_p9), %v1282_v47 }
 0x248   : > { %v1946_v49 = vpop.f32.mrb[36].mxu1 }
 0x249   : > { %v1204_v56 = vadd.f32 %v1946_v49, %v2440_v14  ;;  %v1195_v61 = vpop.f32.mrb[37].mxu1 }
 0x24a   : > { %v1196_v63 = vadd.f32 %v2440_v14, %v1195_v61  ;;  %v1947_v4 = vpop.f32.mrb[38].mxu1 }
 0x24b   : > { %v1207_v7 = vadd.f32 %v1947_v4, %v2440_v14  ;;  %v1198_v8 = vpop.f32.mrb[39].mxu1  ;;  %v1264_v10 = vmax.f32 %v1204_v56, 0.0 }
 0x24c   : > { %v1199_v9 = vadd.f32 %v2440_v14, %v1198_v8  ;;  %v1262_v12 = vmax.f32 %v1196_v63, 0.0 }
 0x24d   : > { %v1265_v11 = vmax.f32 %v1207_v7, 0.0 }
 0x24e   : > { %v1263_v13 = vmax.f32 %v1199_v9, 0.0 }
 0x24f   : > { %v2505_v15 = vpack.c.bf16 %v1265_v11, %v1264_v10 }
 0x250   : > { %v2507_v16 = vpack.c.bf16 %v1263_v13, %v1262_v12  ;;  %v1950_v17 = vpop.f32.mrb[40].mxu1 }
 0x251   : > { %1320 = vst [vmem:[%s2450_s20 + $0x58] sm:$0xff] %v2505_v15  ;;  %v1220_v18 = vadd.f32 %v1950_v17, %v2440_v14  ;;  %v1211_v20 = vpop.f32.mrb[41].mxu1 }
 0x252   : > { %1319 = vst [vmem:[%s2450_s20 + $0x50] sm:$0xff] %v2507_v16  ;;  %v1212_v24 = vadd.f32 %v2440_v14, %v1211_v20  ;;  %v1951_v25 = vpop.f32.mrb[42].mxu1 }
 0x253   : > { %v1223_v26 = vadd.f32 %v1951_v25, %v2440_v14  ;;  %v1214_v27 = vpop.f32.mrb[43].mxu1  ;;  %v1268_v30 = vmax.f32 %v1220_v18, 0.0 }
 0x254   : > { %v1215_v29 = vadd.f32 %v2440_v14, %v1214_v27  ;;  %v1266_v32 = vmax.f32 %v1212_v24, 0.0 }
 0x255   : > { %v1269_v31 = vmax.f32 %v1223_v26, 0.0 }
 0x256   : > { %v1267_v34 = vmax.f32 %v1215_v29, 0.0 }
 0x257   : > { %v2517_v36 = vpack.c.bf16 %v1269_v31, %v1268_v30 }
 0x258   : > { %v2519_v37 = vpack.c.bf16 %v1267_v34, %v1266_v32  ;;  %v1954_v38 = vpop.f32.mrb[44].mxu1 }
 0x259   : > { %1322 = vst [vmem:[%s2450_s20 + $0x68] sm:$0xff] %v2517_v36  ;;  %v1236_v41 = vadd.f32 %v1954_v38, %v2440_v14  ;;  %v1227_v43 = vpop.f32.mrb[45].mxu1 }
 0x25a   : > { %1321 = vst [vmem:[%s2450_s20 + $0x60] sm:$0xff] %v2519_v37  ;;  %v1228_v44 = vadd.f32 %v2440_v14, %v1227_v43  ;;  %v1955_v45 = vpop.f32.mrb[46].mxu1 }
 0x25b   : > { %v1239_v46 = vadd.f32 %v1955_v45, %v2440_v14  ;;  %v1230_v48 = vpop.f32.mrb[47].mxu1  ;;  %v1272_v51 = vmax.f32 %v1236_v41, 0.0 }
 0x25c   : > { %v1231_v50 = vadd.f32 %v2440_v14, %v1230_v48  ;;  %v1270_v53 = vmax.f32 %v1228_v44, 0.0  ;;  %1328 = sbr.rel (%p1731_p9) target bundleno = 875 (0x36b), region = 64  ;;  %v2133_v14 = vld [vmem:[%s2715_s4 + $0x8] sm:$0xff] (!%p1731_p9)  }
 0x25d   : > { %v1273_v52 = vmax.f32 %v1239_v46, 0.0  ;;  %1958 = vmatprep.subr.bf16.mxu0 (!%p1731_p9), %v2133_v14  ;;  %2021 = vmatprep.subr.bf16.mxu1 (!%p1731_p9), %v2133_v14 }
 0x25e   : > { %v1271_v54 = vmax.f32 %v1231_v50, 0.0  ;;  %1959 = vmatpush3.bf16.msra.mxu0 (!%p1731_p9), %v2133_v14  ;;  %2029 = vmatpush3.bf16.msra.mxu1 (!%p1731_p9), %v2133_v14 }
 0x25f   : > { %v1289_v55 = vpack.c.bf16 %v1273_v52, %v1272_v51  ;;  %1960 = vmatprep.subr.bf16.mxu0 (!%p1731_p9), %v2134_v62  ;;  %2022 = vmatprep.subr.bf16.mxu1 (!%p1731_p9), %v2134_v62 }
 0x260   : > { %v1288_v59 = vpack.c.bf16 %v1271_v54, %v1270_v53 }
 0x261   : > { %1324 = vst [vmem:[%s2450_s20 + $0x78] sm:$0xff] %v1289_v55 }
 0x262   : > { %1323 = vst [vmem:[%s2450_s20 + $0x70] sm:$0xff] %v1288_v59  ;;  %1961 = vmatpush3.bf16.msra.mxu0 (!%p1731_p9), %v2134_v62  ;;  %2030 = vmatpush3.bf16.msra.mxu1 (!%p1731_p9), %v2134_v62 }
 0x263   : > { %1962 = vmatprep.subr.bf16.mxu0 %v2135_v6  ;;  %2023 = vmatprep.subr.bf16.mxu1 %v2135_v6 }
 0x266   : > { %1963 = vmatpush3.bf16.msra.mxu0 %v2135_v6  ;;  %2031 = vmatpush3.bf16.msra.mxu1 %v2135_v6 }
 0x267   : > { %1964 = vmatprep.subr.bf16.mxu0 %v2136_v0  ;;  %2024 = vmatprep.subr.bf16.mxu1 %v2136_v0 }
 0x26a   : > { %1965 = vmatpush3.bf16.msra.mxu0 %v2136_v0  ;;  %2032 = vmatpush3.bf16.msra.mxu1 %v2136_v0 }
 0x26b   : > { %1966 = vmatprep.subr.bf16.mxu0 %v2137_v1  ;;  %2025 = vmatprep.subr.bf16.mxu1 %v2137_v1 }
 0x26e   : > { %1967 = vmatpush3.bf16.msra.mxu0 %v2137_v1  ;;  %2033 = vmatpush3.bf16.msra.mxu1 %v2137_v1 }
 0x26f   : > { %1968 = vmatprep.subr.bf16.mxu0 %v2138_v2  ;;  %2026 = vmatprep.subr.bf16.mxu1 %v2138_v2 }
 0x272   : > { %1969 = vmatpush3.bf16.msra.mxu0 %v2138_v2  ;;  %2034 = vmatpush3.bf16.msra.mxu1 %v2138_v2 }
 0x273   : > { %1970 = vmatprep.subr.bf16.mxu0 %v2139_v3  ;;  %2027 = vmatprep.subr.bf16.mxu1 %v2139_v3 }
 0x276   : > { %1971 = vmatpush3.bf16.msra.mxu0 %v2139_v3  ;;  %2035 = vmatpush3.bf16.msra.mxu1 %v2139_v3 }
 0x279   : > { %1973 = vmatmul.mubr.bf16.vlgmr.msra.gmra.mrb[0].mxu0 %v2446_v5  ;;  %1989 = vmatmul.mubr.bf16.vlgmr.msra.gmra.mrb[0].mxu1 %v2496_v42  ;;  %v2572_v5 = vld [vmem:[%s2716_s5] ss:$0 sm:$0xff] }
 0x27a   : > { %1976 = vmatprep.mubr.bf16.mxu0 %v2462_v23  ;;  %1992 = vmatprep.mubr.bf16.mxu1 %v2507_v16 }
 0x281   : > { %1977 = vmatmul.mubr.bf16.gmra.mrb[4].mxu0 %v2460_v22  ;;  %1993 = vmatmul.mubr.bf16.gmra.mrb[4].mxu1 %v2505_v15 }
 0x282   : > { %1980 = vmatprep.mubr.bf16.mxu0 %v2474_v40  ;;  %1996 = vmatprep.mubr.bf16.mxu1 %v2519_v37 }
 0x289   : > { %1981 = vmatmul.mubr.bf16.gmra.mrb[8].mxu0 %v2472_v39  ;;  %1997 = vmatmul.mubr.bf16.gmra.mrb[8].mxu1 %v2517_v36 }
 0x28a   : > { %1984 = vmatprep.mubr.bf16.mxu0 %v2486_v58  ;;  %2000 = vmatprep.mubr.bf16.mxu1 %v1288_v59 }
 0x291   : > { %1985 = vmatmul.mubr.bf16.gmra.mrb[12].mxu0 %v2484_v57  ;;  %2001 = vmatmul.mubr.bf16.gmra.mrb[12].mxu1 %v1289_v55 }
 0x34c   : > { %v1974_v22 = vpop.f32.mrb[0].mxu0  ;;  %v1990_v23 = vpop.f32.mrb[0].mxu1 }
 0x34d   : > { %v1443_v40 = vadd.f32 %v1974_v22, %v2572_v5  ;;  %v1507_v19 = vadd.f32 %v1990_v23, %v2572_v5  ;;  %v1434_v39 = vpop.f32.mrb[1].mxu0  ;;  %v1498_v21 = vpop.f32.mrb[1].mxu1 }
 0x34e   : > { %v1435_v28 = vadd.f32 %v2572_v5, %v1434_v39  ;;  %v1499_v58 = vadd.f32 %v2572_v5, %v1498_v21  ;;  %v1975_v33 = vpop.f32.mrb[2].mxu0  ;;  %v1991_v57 = vpop.f32.mrb[2].mxu1 }
 0x34f   : > { %1564 = vst [vmem:[%s2717_s6 + $0x10] sm:$0xff] %v1443_v40  ;;  %1580 = vst [vmem:[%s2717_s6 + $0x90] sm:$0xff] %v1507_v19  ;;  %v1446_v35 = vadd.f32 %v1975_v33, %v2572_v5  ;;  %v1510_v42 = vadd.f32 %v1991_v57, %v2572_v5  ;;  %v1437_v47 = vpop.f32.mrb[3].mxu0  ;;  %v1501_v49 = vpop.f32.mrb[3].mxu1 }
 0x350   : > { %1562 = vst [vmem:[%s2717_s6] sm:$0xff] %v1435_v28  ;;  %1578 = vst [vmem:[%s2717_s6 + $0x80] sm:$0xff] %v1499_v58  ;;  %v1438_v56 = vadd.f32 %v2572_v5, %v1437_v47  ;;  %v1502_v61 = vadd.f32 %v2572_v5, %v1501_v49 }
 0x351   : > { %1565 = vst [vmem:[%s2717_s6 + $0x18] sm:$0xff] %v1446_v35  ;;  %1581 = vst [vmem:[%s2717_s6 + $0x98] sm:$0xff] %v1510_v42 }
 0x352   : > { %1563 = vst [vmem:[%s2717_s6 + $0x8] sm:$0xff] %v1438_v56  ;;  %1579 = vst [vmem:[%s2717_s6 + $0x88] sm:$0xff] %v1502_v61 }
 0x354   : > { %v1978_v63 = vpop.f32.mrb[4].mxu0  ;;  %v1994_v4 = vpop.f32.mrb[4].mxu1 }
 0x355   : > { %v1459_v7 = vadd.f32 %v1978_v63, %v2572_v5  ;;  %v1523_v8 = vadd.f32 %v1994_v4, %v2572_v5  ;;  %v1450_v9 = vpop.f32.mrb[5].mxu0  ;;  %v1514_v10 = vpop.f32.mrb[5].mxu1 }
 0x356   : > { %v1451_v11 = vadd.f32 %v2572_v5, %v1450_v9  ;;  %v1515_v12 = vadd.f32 %v2572_v5, %v1514_v10  ;;  %v1979_v13 = vpop.f32.mrb[6].mxu0  ;;  %v1995_v15 = vpop.f32.mrb[6].mxu1 }
 0x357   : > { %1568 = vst [vmem:[%s2717_s6 + $0x30] sm:$0xff] %v1459_v7  ;;  %1584 = vst [vmem:[%s2717_s6 + $0xb0] sm:$0xff] %v1523_v8  ;;  %v1462_v16 = vadd.f32 %v1979_v13, %v2572_v5  ;;  %v1526_v17 = vadd.f32 %v1995_v15, %v2572_v5  ;;  %v1453_v18 = vpop.f32.mrb[7].mxu0  ;;  %v1517_v20 = vpop.f32.mrb[7].mxu1 }
 0x358   : > { %1566 = vst [vmem:[%s2717_s6 + $0x20] sm:$0xff] %v1451_v11  ;;  %1582 = vst [vmem:[%s2717_s6 + $0xa0] sm:$0xff] %v1515_v12  ;;  %v1454_v24 = vadd.f32 %v2572_v5, %v1453_v18  ;;  %v1518_v25 = vadd.f32 %v2572_v5, %v1517_v20 }
 0x359   : > { %1569 = vst [vmem:[%s2717_s6 + $0x38] sm:$0xff] %v1462_v16  ;;  %1585 = vst [vmem:[%s2717_s6 + $0xb8] sm:$0xff] %v1526_v17 }
 0x35a   : > { %1567 = vst [vmem:[%s2717_s6 + $0x28] sm:$0xff] %v1454_v24  ;;  %1583 = vst [vmem:[%s2717_s6 + $0xa8] sm:$0xff] %v1518_v25 }
 0x35c   : > { %v1982_v26 = vpop.f32.mrb[8].mxu0  ;;  %v1998_v27 = vpop.f32.mrb[8].mxu1 }
 0x35d   : > { %v1475_v29 = vadd.f32 %v1982_v26, %v2572_v5  ;;  %v1539_v30 = vadd.f32 %v1998_v27, %v2572_v5  ;;  %v1466_v31 = vpop.f32.mrb[9].mxu0  ;;  %v1530_v32 = vpop.f32.mrb[9].mxu1 }
 0x35e   : > { %v1467_v34 = vadd.f32 %v2572_v5, %v1466_v31  ;;  %v1531_v36 = vadd.f32 %v2572_v5, %v1530_v32  ;;  %v1983_v37 = vpop.f32.mrb[10].mxu0  ;;  %v1999_v38 = vpop.f32.mrb[10].mxu1 }
 0x35f   : > { %1572 = vst [vmem:[%s2717_s6 + $0x50] sm:$0xff] %v1475_v29  ;;  %1588 = vst [vmem:[%s2717_s6 + $0xd0] sm:$0xff] %v1539_v30  ;;  %v1478_v41 = vadd.f32 %v1983_v37, %v2572_v5  ;;  %v1542_v43 = vadd.f32 %v1999_v38, %v2572_v5  ;;  %v1469_v44 = vpop.f32.mrb[11].mxu0  ;;  %v1533_v45 = vpop.f32.mrb[11].mxu1 }
 0x360   : > { %1570 = vst [vmem:[%s2717_s6 + $0x40] sm:$0xff] %v1467_v34  ;;  %1586 = vst [vmem:[%s2717_s6 + $0xc0] sm:$0xff] %v1531_v36  ;;  %v1470_v46 = vadd.f32 %v2572_v5, %v1469_v44  ;;  %v1534_v48 = vadd.f32 %v2572_v5, %v1533_v45 }
 0x361   : > { %1573 = vst [vmem:[%s2717_s6 + $0x58] sm:$0xff] %v1478_v41  ;;  %1589 = vst [vmem:[%s2717_s6 + $0xd8] sm:$0xff] %v1542_v43 }
 0x362   : > { %1571 = vst [vmem:[%s2717_s6 + $0x48] sm:$0xff] %v1470_v46  ;;  %1587 = vst [vmem:[%s2717_s6 + $0xc8] sm:$0xff] %v1534_v48 }
 0x364   : > { %v1986_v50 = vpop.f32.mrb[12].mxu0  ;;  %v2002_v51 = vpop.f32.mrb[12].mxu1 }
 0x365   : > { %v1491_v52 = vadd.f32 %v1986_v50, %v2572_v5  ;;  %v1555_v53 = vadd.f32 %v2002_v51, %v2572_v5  ;;  %v1482_v54 = vpop.f32.mrb[13].mxu0  ;;  %v1546_v55 = vpop.f32.mrb[13].mxu1 }
 0x366   : > { %v1483_v59 = vadd.f32 %v2572_v5, %v1482_v54  ;;  %v1547_v60 = vadd.f32 %v2572_v5, %v1546_v55  ;;  %v1987_v14 = vpop.f32.mrb[14].mxu0  ;;  %v2003_v62 = vpop.f32.mrb[14].mxu1 }
 0x367   : > { %1576 = vst [vmem:[%s2717_s6 + $0x70] sm:$0xff] %v1491_v52  ;;  %1592 = vst [vmem:[%s2717_s6 + $0xf0] sm:$0xff] %v1555_v53  ;;  %v1494_v6 = vadd.f32 %v1987_v14, %v2572_v5  ;;  %v1558_v0 = vadd.f32 %v2003_v62, %v2572_v5  ;;  %v1485_v1 = vpop.f32.mrb[15].mxu0  ;;  %v1549_v2 = vpop.f32.mrb[15].mxu1 }
 0x368   : > { %1574 = vst [vmem:[%s2717_s6 + $0x60] sm:$0xff] %v1483_v59  ;;  %1590 = vst [vmem:[%s2717_s6 + $0xe0] sm:$0xff] %v1547_v60  ;;  %v1486_v3 = vadd.f32 %v2572_v5, %v1485_v1  ;;  %v1550_v22 = vadd.f32 %v2572_v5, %v1549_v2 }
 0x369   : > { %1577 = vst [vmem:[%s2717_s6 + $0x78] sm:$0xff] %v1494_v6  ;;  %1593 = vst [vmem:[%s2717_s6 + $0xf8] sm:$0xff] %v1558_v0 }
 0x36a   : > { %1575 = vst [vmem:[%s2717_s6 + $0x68] sm:$0xff] %v1486_v3  ;;  %1591 = vst [vmem:[%s2717_s6 + $0xe8] sm:$0xff] %v1550_v22 }
 0x36b PF: > { %s16_s23 = sadd.s32 1, %s2162_s23   ;;  %s2718_s21 = smov %s2158_s22 }
 0x36c   : > { %p13_p10 = scmp.ge.s32.totalorder %s16_s23, 9   ;;  %s2719_s22 = smov %s2721_s24 }
 0x36e   :  { %15 = sbr.rel (!%p13_p10) target bundleno = 2 (0x2), region = 95 }

</bundles_post_ra>
